<compile_context>
chip_gen: v7x
topology: tpu7x:2x2x1
jax: 0.10.0
libtpu: 0.0.40
codegen_flags: <defaults>
</compile_context>

<pallas_src>
import jax
import jax.numpy as jnp
import numpy as np
from jax.experimental import pallas as pl
from jax.experimental.pallas import tpu as pltpu

# ----------------------------- configuration ---------------------------------
B = 8                      # batch size
NUM_FLOAT_FEATURES = 10
NUM_EMB = 16               # num_embeddings for every table
EMB_DIM = 8                # embedding_dim for every table
# over in_features = 8 (dense) + 16 (tower0) + 8 (tower1) + 8 (tables[1]) + 8 (weighted) = 48
OVER_IN = 8 + 2 * EMB_DIM + EMB_DIM + EMB_DIM + EMB_DIM
OVER_OUT = 16
# folded activation slab: float_features | bag0 | bag1 | bag2 | bag3 | wbag | 1
SLAB_F = NUM_FLOAT_FEATURES + 5 * NUM_EMB + 1          # 91
LANE = 128                                             # pad to one full lane tile


# ------------------------------- Pallas kernel --------------------------------
def tower_sparsenn_kernel(x_ref, w_ref, out_ref):
    # x_ref: [B_pad, 128]  (activation slab, lanes >= SLAB_F are zero)
    # w_ref: [128, 128]    (folded weight, only column 0 / rows < SLAB_F are real)
    logits = jnp.dot(x_ref[...], w_ref[...], preferred_element_type=jnp.float32)
    out_ref[...] = jax.nn.sigmoid(logits)              # lane-dense [B_pad, 128] store


def tower_sparsenn_forward(x_slab, w_fold):
    """x_slab: [B, SLAB_F] activation slab; w_fold: [SLAB_F, 1] folded weights.
    Returns pred [B]."""
    b = x_slab.shape[0]
    b_pad = max(8, ((b + 7) // 8) * 8)
    # Zero-pad both operands to exact (8,128)-aligned f32 tiles.
    x_pad = jnp.zeros((b_pad, LANE), jnp.float32).at[:b, :SLAB_F].set(x_slab)
    w_pad = jnp.zeros((LANE, LANE), jnp.float32).at[:SLAB_F, 0].set(w_fold[:, 0])
    out = pl.pallas_call(
        tower_sparsenn_kernel,
        out_shape=jax.ShapeDtypeStruct((b_pad, LANE), jnp.float32),
        in_specs=[pl.BlockSpec(memory_space=pltpu.MemorySpace.VMEM)] * 2,
        out_specs=pl.BlockSpec(memory_space=pltpu.MemorySpace.VMEM),
    )(x_pad, w_pad)
    return out[:b, 0]


# --------------------------- wrapper-side fold ---------------------------------
def fold_params(emb0, emb1, emb2, emb3, wemb, dw, db, t0w, t0b, t1w, t1b, ow, ob):
    """Fold the fully-affine eval path into a single [SLAB_F, 1] weight column
    (last row is the folded bias, matched with a ones-column in the slab)."""
    m = jnp.full((OVER_OUT, 1), 1.0 / OVER_OUT, jnp.float32)    # mean over 16 outs
    v = ow @ m                                                  # [48, 1]
    v_dense = v[0:8]
    v_t0 = v[8:24]
    v_t1 = v[24:32]
    v_p1 = v[32:40]
    v_pw = v[40:48]
    w_ff = dw @ v_dense                                          # [10, 1]
    w_bag0 = emb0 @ (t1w @ v_t1)                                 # [16, 1]
    w_bag1 = emb1 @ v_p1                                         # [16, 1]
    w_bag2 = emb2 @ (t0w[0:EMB_DIM, :] @ v_t0)                   # [16, 1]
    w_bag3 = emb3 @ (t0w[EMB_DIM:2 * EMB_DIM, :] @ v_t0)         # [16, 1]
    w_wbag = wemb @ v_pw                                         # [16, 1]
    b_fold = db @ v_dense + t0b @ v_t0 + t1b @ v_t1 + ob @ m     # [1, 1]
    return jnp.concatenate(
        [w_ff, w_bag0, w_bag1, w_bag2, w_bag3, w_wbag, b_fold], axis=0)  # [91, 1]


def build_slab(ff, bag0, bag1, bag2, bag3, wbag):
    ones = jnp.ones((ff.shape[0], 1), jnp.float32)
    return jnp.concatenate([ff, bag0, bag1, bag2, bag3, wbag, ones], axis=1)


# ------------------------------- glue helpers ---------------------------------
def bag_matrix(lengths, indices, num_emb, weights=None):
    """Convert one jagged feature (lengths/indices[/weights]) into a dense
    [B, num_emb] bag matrix (counts, or summed per-id weights) so sum-pooled
    EmbeddingBag == bag @ table. Built with dense matmuls (no XLA scatter)."""
    n = int(indices.shape[0])
    bsz = int(lengths.shape[0])
    sample_ids = jnp.repeat(jnp.arange(bsz, dtype=jnp.int32), lengths,
                            total_repeat_length=n)
    assign = (sample_ids[None, :] ==
              jnp.arange(bsz, dtype=jnp.int32)[:, None]).astype(jnp.float32)  # [B, n]
    if weights is not None:
        assign = assign * weights[None, :]
    onehot = (indices[:, None] ==
              jnp.arange(num_emb, dtype=jnp.int32)[None, :]).astype(jnp.float32)  # [n, E]
    return assign @ onehot                                                        # [B, E]


def linear_params(key, in_f, out_f):
    """Deterministic Linear init (uniform, torch-style bound). Weight stored
    already transposed as [in_f, out_f] so the math is x @ W + b."""
    kw, kb = jax.random.split(key)
    bound = 1.0 / np.sqrt(in_f)
    w = jax.random.uniform(kw, (in_f, out_f), jnp.float32, -bound, bound)
    b = jax.random.uniform(kb, (1, out_f), jnp.float32, -bound, bound)
    return w, b


def jax_reference(ff, bag0, bag1, bag2, bag3, wbag,
                  emb0, emb1, emb2, emb3, wemb,
                  dw, db, t0w, t0b, t1w, t1b, ow, ob):
    """Pure-JAX UNFUSED reference replicating the original module math."""
    dense_r = ff @ dw + db
    p2, p3 = bag2 @ emb2, bag3 @ emb3
    tower0 = jnp.concatenate([p2, p3], axis=1) @ t0w + t0b
    tower1 = (bag0 @ emb0) @ t1w + t1b
    p1, pw = bag1 @ emb1, wbag @ wemb
    over_in = jnp.concatenate([dense_r, tower0, tower1, p1, pw], axis=1)
    over_r = over_in @ ow + ob
    return jax.nn.sigmoid(jnp.mean(over_r, axis=1))


# ---------------------------------- main --------------------------------------
if __name__ == "__main__":
    root = jax.random.PRNGKey(0)
    keys = jax.random.split(root, 32)
    ki = iter(keys)

    # ----- ModelInput (synthetic, deterministic) -----
    float_features = jax.random.uniform(next(ki), (B, NUM_FLOAT_FEATURES), jnp.float32)

    def make_jagged(key, weighted=False, pooling_avg=3):
        k1, k2, k3 = jax.random.split(key, 3)
        lengths = jnp.abs(jax.random.normal(k1, (B,)) + pooling_avg).astype(jnp.int32)
        lengths = jnp.maximum(lengths, 1)
        n = int(np.asarray(jnp.sum(lengths)))
        indices = jax.random.randint(k2, (n,), 0, NUM_EMB, dtype=jnp.int32)
        weights = jax.random.uniform(k3, (n,), jnp.float32) if weighted else None
        return lengths, indices, weights

    # idlist features: feature_0..feature_3 ; idscore: weighted_feature_0
    bags = []
    for _ in range(4):
        lengths, indices, _ = make_jagged(next(ki))
        bags.append(bag_matrix(lengths, indices, NUM_EMB))
    wl, wi, ww = make_jagged(next(ki), weighted=True)
    wbag = bag_matrix(wl, wi, NUM_EMB, weights=ww)

    # ----- parameters (deterministic) -----
    emb_tables = [0.1 * jax.random.normal(next(ki), (NUM_EMB, EMB_DIM), jnp.float32)
                  for _ in range(4)]
    wemb_table = 0.1 * jax.random.normal(next(ki), (NUM_EMB, EMB_DIM), jnp.float32)

    dw, db = linear_params(next(ki), NUM_FLOAT_FEATURES, 8)        # TestDenseArch
    t0w, t0b = linear_params(next(ki), 2 * EMB_DIM, 2 * EMB_DIM)   # tower_0 interaction
    t1w, t1b = linear_params(next(ki), EMB_DIM, EMB_DIM)           # tower_1 interaction
    ow, ob = linear_params(next(ki), OVER_IN, OVER_OUT)            # over

    # ----- fold parameters & pack activations (wrapper-side, once) -----
    w_fold = fold_params(emb_tables[0], emb_tables[1], emb_tables[2], emb_tables[3],
                         wemb_table, dw, db, t0w, t0b, t1w, t1b, ow, ob)
    x_slab = build_slab(float_features, bags[0], bags[1], bags[2], bags[3], wbag)

    # ----- fused Pallas kernel -----
    pred = tower_sparsenn_forward(x_slab, w_fold)
    pred = jax.block_until_ready(pred)

    # ----- correctness vs. unfused reference -----
    ref = jax.block_until_ready(
        jax_reference(float_features, bags[0], bags[1], bags[2], bags[3], wbag,
                      emb_tables[0], emb_tables[1], emb_tables[2], emb_tables[3],
                      wemb_table, dw, db, t0w, t0b, t1w, t1b, ow, ob))
    np.testing.assert_allclose(np.asarray(pred), np.asarray(ref), rtol=1e-4, atol=1e-5)
    assert pred.shape == (B,)

    print("KERNEL_OK")
</pallas_src>

<mosaic_0001>
module attributes {stable_mosaic.version = 11 : i64} {
  func.func @tower_sparsenn_kernel(%arg0: memref<8x128xf32, #tpu.memory_space<vmem>>, %arg1: memref<128x128xf32, #tpu.memory_space<vmem>>, %arg2: memref<8x128xf32, #tpu.memory_space<vmem>>) attributes {dimension_semantics = [], scalar_prefetch = 0 : i64, scratch_operands = 0 : i64, tpu.core_type = #tpu.core_type<tc>} {
    %c0 = arith.constant 0 : index
    %c0_0 = arith.constant 0 : index
    %0 = vector.load %arg0[%c0, %c0_0] : memref<8x128xf32, #tpu.memory_space<vmem>>, vector<8x128xf32>
    %c0_1 = arith.constant 0 : index
    %c0_2 = arith.constant 0 : index
    %1 = vector.load %arg1[%c0_1, %c0_2] : memref<128x128xf32, #tpu.memory_space<vmem>>, vector<128x128xf32>
    %cst = arith.constant dense<0.000000e+00> : vector<8x128xf32>
    %2 = tpu.matmul %0, %1, %cst {dimension_numbers = #tpu.dot_dimension_numbers<[1], [0], [0], [1], [0, 0, 1, 1], [], []>} : vector<8x128xf32>, vector<128x128xf32>, vector<8x128xf32> -> vector<8x128xf32>
    %3 = arith.negf %2 : vector<8x128xf32>
    %4 = math.exp %3 : vector<8x128xf32>
    %cst_3 = arith.constant 1.000000e+00 : f32
    %5 = vector.broadcast %cst_3 : f32 to vector<8x128xf32>
    %6 = arith.addf %5, %4 : vector<8x128xf32>
    %7 = arith.divf %5, %6 : vector<8x128xf32>
    %c0_4 = arith.constant 0 : index
    %c0_5 = arith.constant 0 : index
    %8 = vector.load %arg2[%c0_4, %c0_5] : memref<8x128xf32, #tpu.memory_space<vmem>>, vector<8x128xf32>
    tpu.vector_store %arg2[%c0_4, %c0_5], %7 {strides = array<i32>} : memref<8x128xf32, #tpu.memory_space<vmem>>, vector<8x128xf32>,
    return
  }
}

</mosaic_0001>

<bundles_post_ra>
// kernel: tpu_custom_call.1
= control target key start
LH: loop header
LB: loop body
LE: loop exit
PB: predicated region body
PF: predicated region fallthrough
CT: control target
= control target key end

     0   :  { %7 = vsyncpa [#allocation3], 0  ;;  %s375_s0 = inlined_call_operand.hbm [shape: f32[8,128], index: 0, kind: input, shape index: {}]   ;;  %s376_s1 = inlined_call_operand.hbm [shape: f32[128,128], index: 1, kind: input, shape index: {}]   ;;  %s377_s2 = inlined_call_operand.hbm [shape: f32[8,128], index: 2, kind: output, shape index: {}]  }
   0x1   :  { %8 = vsyncpa [#allocation6], 0 }
   0x2   :  { %9 = vsyncpa [#allocation4], 0  ;;  %s309_s9 = smov [#allocation2]   ;;  %s310_s11 = smov [#allocation5]  }
   0x3   :  { %s16_s10 = sshll.u32 %s309_s9, 4  ;;  %s25_s12 = sshll.u32 %s310_s11, 4  ;;  %s17_s10 = int_to_ptr.vmem [resolvable:$true] %s16_s10  ;;  %s332_s12 = int_to_ptr.vmem [resolvable:$true] %s25_s12 }
   0x4   :  { %s237_s15 = scalar_lea.hbm %s375_s0, 128 }
   0x5   :  { %p238_p0 = scmp.ne.s32.totalorder %s375_s0, %s237_s15  ;;  %p241_p1 = scmp.lt.u32.totalorder %s237_s15, %s375_s0 }
   0x7   :  { %p243_p2 = pnand %p241_p1, %p238_p0 }
   0x9   :  { %246 = shalt.err (!%p243_p2)
}
   0xa   :  { %s247_s20 = scalar_lea.vmem %s17_s10, 128  ;;  %p252_p4 = scmp.lt.s32.totalorder %s17_s10, %s17_s10 }
   0xb   :  { %p248_p3 = scmp.ne.s32.totalorder %s17_s10, %s247_s20  ;;  %p253_p5 = scmp.lt.s32.totalorder %s247_s20, %s247_s20 }
   0xd   :  { %p254_p6 = por %p253_p5, %p252_p4 }
   0xf   :  { %p255_p7 = pnand %p254_p6, %p248_p3 }
  0x11   :  { %258 = shalt.err (!%p255_p7)
}
  0x12   :  { %19 = dma.hbm_to_vmem [thread:$0]  %s375_s0, 128, %s17_s10, [#allocation3]  }
  0x13   :  { %s259_s25 = scalar_lea.hbm %s376_s1, 2048 }
  0x14   :  { %p260_p8 = scmp.ne.s32.totalorder %s376_s1, %s259_s25  ;;  %p263_p9 = scmp.lt.u32.totalorder %s259_s25, %s376_s1 }
  0x16   :  { %p265_p10 = pnand %p263_p9, %p260_p8 }
  0x18   :  { %268 = shalt.err (!%p265_p10)
}
  0x19   :  { %s269_s30 = scalar_lea.vmem %s332_s12, 2048  ;;  %p274_p12 = scmp.lt.s32.totalorder %s332_s12, %s332_s12 }
  0x1a   :  { %p270_p11 = scmp.ne.s32.totalorder %s332_s12, %s269_s30  ;;  %p275_p13 = scmp.lt.s32.totalorder %s269_s30, %s269_s30 }
  0x1c   :  { %p276_p0 = por %p275_p13, %p274_p12 }
  0x1e   :  { %p277_p1 = pnand %p276_p0, %p270_p11 }
  0x20   :  { %280 = shalt.err (!%p277_p1)
}
  0x21   :  { %s311_s0 = smov 128   ;;  %s312_s3 = smov 8  }
  0x22   :  { %31 = dma.hbm_to_vmem [thread:$0]  %s376_s1, 2048, %s332_s12, [#allocation6], %s311_s0, %s311_s0, %s312_s3  }
  0x23   :  { %303 = dma.done.wait [#allocation3], 128  }
  0x24   :  { %304 = vsyncadd [#allocation3], 4294967168 }
  0x25   :  { %305 = dma.done.wait [#allocation6], 2048  }
  0x26   :  { %306 = vsyncadd [#allocation6], 4294965248  ;;  %v313_v0 = vmov 0.0|0.0   ;;  %vm314_vm0 = vmmov 0   ;;  %v315_v1 = vmov 0.0   ;;  %v39_v2 = vld [vmem:[#allocation5] sm:$0xff] }
  0x27   :  { %201 = vmatprep.subr.bf16.mxu0 %v313_v0  ;;  %198 = vmatprep.mubr.msk.f32.mxu0 %vm314_vm0, %v315_v1  ;;  %v40_v3 = vld [vmem:[#allocation5 + $0x8] sm:$0xff]  ;;  %v41_v4 = vld [vmem:[#allocation5 + $0x10] sm:$0xff]  ;;  %v42_v6 = vld [vmem:[#allocation5 + $0x18] sm:$0xff]  ;;  %s316_s1 = smov [#allocation7]  }
  0x28   :  { %v202_v5 = vpack.c.bf16 %v40_v3, %v39_v2  ;;  %v205_v7 = vpack.c.bf16 %v42_v6, %v41_v4  ;;  %v43_v8 = vld [vmem:[#allocation5 + $0x20] sm:$0xff]  ;;  %v44_v9 = vld [vmem:[#allocation5 + $0x28] sm:$0xff]  ;;  %v45_v11 = vld [vmem:[#allocation5 + $0x30] sm:$0xff]  ;;  %s138_s6 = sshll.u32 %s316_s1, 4  ;;  %s139_s6 = int_to_ptr.vmem [resolvable:$true] %s138_s6 }
  0x29   :  { %v208_v10 = vpack.c.bf16 %v44_v9, %v43_v8  ;;  %v46_v12 = vld [vmem:[#allocation5 + $0x38] sm:$0xff]  ;;  %v47_v14 = vld [vmem:[#allocation5 + $0x40] sm:$0xff]  ;;  %v48_v15 = vld [vmem:[#allocation5 + $0x48] sm:$0xff]  ;;  %s281_s7 = scalar_lea.vmem %s139_s6, 128  ;;  %p286_p3 = scmp.lt.s32.totalorder %s139_s6, %s139_s6 }
  0x2a   :  { %203 = vmatpush3.bf16.msra.mxu0 %v202_v5  ;;  %v211_v13 = vpack.c.bf16 %v46_v12, %v45_v11  ;;  %v214_v16 = vpack.c.bf16 %v48_v15, %v47_v14  ;;  %v49_v17 = vld [vmem:[#allocation5 + $0x50] sm:$0xff]  ;;  %v50_v18 = vld [vmem:[#allocation5 + $0x58] sm:$0xff]  ;;  %v51_v20 = vld [vmem:[#allocation5 + $0x60] sm:$0xff]  ;;  %p282_p2 = scmp.ne.s32.totalorder %s139_s6, %s281_s7  ;;  %p287_p4 = scmp.lt.s32.totalorder %s281_s7, %s281_s7 }
  0x2b   :  { %204 = vmatprep.subr.bf16.mxu0 %v313_v0  ;;  %v217_v19 = vpack.c.bf16 %v50_v18, %v49_v17  ;;  %v52_v21 = vld [vmem:[#allocation5 + $0x68] sm:$0xff]  ;;  %v53_v23 = vld [vmem:[#allocation5 + $0x70] sm:$0xff]  ;;  %v54_v24 = vld [vmem:[#allocation5 + $0x78] sm:$0xff] }
  0x2c   :  { %v220_v22 = vpack.c.bf16 %v52_v21, %v51_v20  ;;  %v223_v25 = vpack.c.bf16 %v54_v24, %v53_v23  ;;  %v38_v26 = vld [vmem:[#allocation2] sm:$0xff]  ;;  %p288_p5 = por %p287_p4, %p286_p3 }
  0x2e   :  { %206 = vmatpush3.bf16.msra.mxu0 %v205_v7  ;;  %p289_p6 = pnand %p288_p5, %p282_p2 }
  0x2f   :  { %207 = vmatprep.subr.bf16.mxu0 %v313_v0 }
  0x32   :  { %209 = vmatpush3.bf16.msra.mxu0 %v208_v10 }
  0x33   :  { %210 = vmatprep.subr.bf16.mxu0 %v313_v0 }
  0x36   :  { %212 = vmatpush3.bf16.msra.mxu0 %v211_v13 }
  0x37   :  { %213 = vmatprep.subr.bf16.mxu0 %v313_v0 }
  0x3a   :  { %215 = vmatpush3.bf16.msra.mxu0 %v214_v16 }
  0x3b   :  { %216 = vmatprep.subr.bf16.mxu0 %v313_v0 }
  0x3e   :  { %218 = vmatpush3.bf16.msra.mxu0 %v217_v19 }
  0x3f   :  { %219 = vmatprep.subr.bf16.mxu0 %v313_v0 }
  0x42   :  { %221 = vmatpush3.bf16.msra.mxu0 %v220_v22 }
  0x43   :  { %222 = vmatprep.subr.bf16.mxu0 %v313_v0 }
  0x46   :  { %224 = vmatpush3.bf16.msra.mxu0 %v223_v25 }
  0x49   :  { %199 = vmatmul.mubr.f32.vlgmr.msra.gmra.mrb[0].mxu0 %v38_v26 }
 0x11c   :  { %v121_v27 = vpop.f32.mrb[0].mxu0 }
 0x11d   :  { %v148_v28 = vmul.f32 -1.442695, %v121_v27  ;;  %v200_v29 = vpop.f32.mrb[1].mxu0 }
 0x11f   :  { %233 = vpow2.f32 %v148_v28 }
 0x129   :  { %v234_v30 = vpop.eup %233 }
 0x12a   :  { %v128_v31 = vadd.f32 1.0, %v234_v30 }
 0x12c   :  { %235 = vrcp.f32 %v128_v31 }
 0x136   :  { %v236_v32 = vpop.eup %235 }
 0x137   :  { %131 = vst [vmem:[#allocation7] sm:$0xff] %v236_v32 }
 0x138   :  { %292 = shalt.err (!%p289_p6)
}
 0x139   :  { %s293_s10 = scalar_lea.hbm %s377_s2, 128 }
 0x13a   :  { %p294_p7 = scmp.ne.s32.totalorder %s377_s2, %s293_s10  ;;  %p297_p8 = scmp.lt.u32.totalorder %s293_s10, %s377_s2 }
 0x13c   :  { %p299_p9 = pnand %p297_p8, %p294_p7 }
 0x13e   :  { %302 = shalt.err (!%p299_p9)
}
 0x13f   :  { %141 = dma.vmem_to_hbm [thread:$0]  %s139_s6, 128, %s377_s2, [#allocation4]  }
 0x140   :  { %307 = dma.done.wait [#allocation4], 128  }
 0x141   :  { %308 = vsyncadd [#allocation4], 4294967168 }
 0x142   :  { %145 = vsyncpa [#allocation3], 1 }
 0x143   :  { %146 = vsyncpa [#allocation6], 1 }
 0x144   :  { %147 = vsyncpa [#allocation4], 1 }

</bundles_post_ra>
